<compile_context>
chip_gen: v7x
topology: tpu7x:2x2x1
jax: 0.10.0
libtpu: 0.0.40
codegen_flags: <defaults>
</compile_context>

<pallas_src>
import math
import numpy as np
import jax
import jax.numpy as jnp
from jax.experimental import pallas as pl
from jax.experimental.pallas import tpu as pltpu

_LANE = 128
_K = 12            # FIR kernel size (up & down)
_RATIO = 2         # up & down ratio
_H = _K // 2       # taps per polyphase branch = 6
_HALO = 8          # left halo rows per time tile (need 6, rounded to 8 sublanes)
_TAIL = 2 * _HALO  # 16 rows fetched by the halo BlockSpec (right halo of this tile)


def _cdiv(a, b):
    return -(-a // b)


def _round_up(a, b):
    return _cdiv(a, b) * b


# -----------------------------------------------------------------------------
# Deterministic filter construction (same math as alias_free_torch.filter)
# -----------------------------------------------------------------------------
def kaiser_sinc_filter1d(cutoff, half_width, kernel_size):
    even = (kernel_size % 2 == 0)
    half_size = kernel_size // 2
    delta_f = 4 * half_width
    A = 2.285 * (half_size - 1) * math.pi * delta_f + 7.95
    if A > 50.0:
        beta = 0.1102 * (A - 8.7)
    elif A >= 21.0:
        beta = 0.5842 * (A - 21.0) ** 0.4 + 0.07886 * (A - 21.0)
    else:
        beta = 0.0
    window = np.kaiser(kernel_size, beta)  # == torch.kaiser_window(periodic=False)
    if even:
        time = np.arange(-half_size, half_size) + 0.5
    else:
        time = np.arange(kernel_size) - half_size
    if cutoff == 0:
        filt = np.zeros_like(time)
    else:
        filt = 2 * cutoff * window * np.sinc(2 * cutoff * time)
        filt = filt / filt.sum()
    return filt.astype(np.float32)  # shape (kernel_size,)


# -----------------------------------------------------------------------------
# Banded FIR matrices for one time tile (polyphase upsample + downsample).
#
# A tile producing output rows t in [0, tt) reads the input window
#     w[q] = x[clamp(t0 + q - 8, 0, T-1)],   q in [0, tt+16)
# split as body = w[0:tt] and tail = w[tt:tt+16].  With the 2x-upsampled, activated
# signal a[2i] = a_e(i), a[2i+1] = a_o(i):
#     a_o(i) = tanh(sum_r 2*f_up[2r]   * x[i+3-r])        r = 0..5
#     a_e(i) = tanh(sum_r 2*f_up[2r+1] * x[i+2-r])
#     out[t] = sum_s f_dn[2s]*a_o(t+s-3) + f_dn[2s+1]*a_e(t+s-2)
# Stacking the tt+6 needed rows of each phase (odd, then even; padded to P = tt+8):
#     A   = tanh(U @ w)       with U: (2P, tt+16) banded
#     out = D @ A             with D: (tt, 2P)    banded
# -----------------------------------------------------------------------------
def _build_fir_matrices(f_up, f_dn, tt):
    P = tt + 8
    wn = tt + _TAIL
    fu2 = _RATIO * np.asarray(f_up, np.float64)   # fold the up-ratio gain into the taps
    fd = np.asarray(f_dn, np.float64)
    U = np.zeros((2 * P, wn), np.float64)
    for j in range(tt + 6):
        for r in range(_H):
            U[j, j + 8 - r] += fu2[2 * r]            # odd  phase a_o
            U[P + j, j + 7 - r] += fu2[2 * r + 1]    # even phase a_e
    D = np.zeros((tt, 2 * P), np.float64)
    for t in range(tt):
        for s in range(_H):
            D[t, t + s] += fd[2 * s]                 # a_o taps
            D[t, P + t + s + 1] += fd[2 * s + 1]     # a_e taps
    return (U[:, :tt].astype(np.float32),            # U_body: (2P, tt)
            U[:, tt:].astype(np.float32),            # U_tail: (2P, 16)
            D.astype(np.float32))                    # D:      (tt, 2P)


# -----------------------------------------------------------------------------
# VMEM accounting (single source of truth for tile choice and vmem_limit_bytes)
# -----------------------------------------------------------------------------
def _vmem_estimate_bytes(tt, tile_c):
    f32 = 4
    two_p = 2 * (tt + 8)
    return (
        2 * tt * tile_c * f32                                   # body input (double-buffered)
        + 2 * _TAIL * tile_c * f32                              # halo input (double-buffered)
        + 2 * tt * tile_c * f32                                 # output     (double-buffered)
        + 2 * (two_p * tt + two_p * _TAIL + tt * two_p) * f32   # FIR matrices (2 buffers each)
        + 3 * two_p * tile_c * f32                              # matmul / tanh temporaries
    )


def _vmem_budget_bytes():
    phys = 64 << 20            # assume the smallest (v7x) part if the query fails
    try:
        get_info = getattr(pltpu, "get_tpu_info", None)
        if get_info is not None:
            phys = int(getattr(get_info(), "vmem_capacity_bytes", phys))
    except Exception:
        pass
    # leave the compiler >= 1/4 of physical VMEM headroom (<= 48 MiB on v7x)
    return min((phys * 3) // 4, 96 << 20)


def _largest_channel_tile(c_pad, cap):
    cap = max(_LANE, min(cap, c_pad))
    for m in range(cap // _LANE, 0, -1):
        if c_pad % (m * _LANE) == 0:
            return m * _LANE
    return _LANE


# -----------------------------------------------------------------------------
# Kernel: one (batch, time-tile, channel-tile) step, all FIR MACs on the MXU
# -----------------------------------------------------------------------------
def _act1d_kernel(u_body_ref, u_tail_ref, d_ref, body_ref, tail_ref, o_ref):
    # body_ref : (1, tt, tile_c)  input rows [t0-8, t0+tt-8)   (edge-padded operand)
    # tail_ref : (1, 16, tile_c)  input rows [t0+tt-8, t0+tt+8)
    body = body_ref[0]
    tail = tail_ref[0]
    pre = jnp.dot(u_body_ref[...], body, preferred_element_type=jnp.float32)
    pre = pre + jnp.dot(u_tail_ref[...], tail, preferred_element_type=jnp.float32)
    a = jnp.tanh(pre)                                   # (2P, tile_c) stacked phases (EUP)
    out = jnp.dot(d_ref[...], a, preferred_element_type=jnp.float32)
    o_ref[0] = out.astype(o_ref.dtype)


# -----------------------------------------------------------------------------
# Exact (tiny) jnp reference used only to patch the 3 boundary samples per side
# -----------------------------------------------------------------------------
def _edge_reference(xs, f_up, f_dn):
    """Exact Activation1d on a short [B, C, L] slice (plain jnp, L <= ~9)."""
    K = _K
    ratio = _RATIO
    L = xs.shape[-1]
    pad = K // ratio - 1
    pad_left = pad * ratio + (K - ratio) // 2
    pad_right = pad * ratio + (K - ratio + 1) // 2
    fu = jnp.asarray(f_up, jnp.float32)
    fd = jnp.asarray(f_dn, jnp.float32)
    xp = jnp.pad(xs.astype(jnp.float32), ((0, 0), (0, 0), (pad, pad)), mode="edge")
    Lp = L + 2 * pad
    Lfull = (Lp - 1) * ratio + K
    y = jnp.zeros(xs.shape[:-1] + (Lfull,), jnp.float32)
    for j in range(Lp):
        y = y.at[..., j * ratio:j * ratio + K].add(xp[..., j:j + 1] * fu)
    y = ratio * y
    y = y[..., pad_left:Lfull - pad_right]
    a = jnp.tanh(y)
    ap = jnp.pad(a, ((0, 0), (0, 0), (K // 2 - 1, K // 2)), mode="edge")
    Tout = (ap.shape[-1] - K) // ratio + 1
    cols = [jnp.sum(ap[..., t * ratio:t * ratio + K] * fd, axis=-1) for t in range(Tout)]
    return jnp.stack(cols, axis=-1)


# -----------------------------------------------------------------------------
# Forward wrapper
# -----------------------------------------------------------------------------
def activation1d_forward(x, up_ratio=2, down_ratio=2, up_kernel_size=12,
                         down_kernel_size=12, time_tile=None, channel_tile=None):
    # Default Activation1d configuration (polyphase offsets are hard-coded for it).
    assert up_ratio == 2 and down_ratio == 2
    assert up_kernel_size == 12 and down_kernel_size == 12
    B, C, T = x.shape
    out_dtype = x.dtype

    f_up = kaiser_sinc_filter1d(0.5 / up_ratio, 0.6 / up_ratio, up_kernel_size)
    f_dn = kaiser_sinc_filter1d(0.5 / down_ratio, 0.6 / down_ratio, down_kernel_size)

    # ---- tile selection -----------------------------------------------------
    c_pad = _round_up(C, _LANE)
    tile_c = channel_tile if channel_tile is not None else _largest_channel_tile(c_pad, 1024)
    assert tile_c % _LANE == 0 and c_pad % tile_c == 0

    # Moderate time tile keeps the banded-matmul FLOPs under the HBM roofline on all gens.
    tt = time_tile if time_tile is not None else (256 if c_pad >= 256 else 512)
    tt = min(tt, _round_up(T, 16))
    tt = max(16, (tt // 16) * 16)

    # v7x megacore: guarantee >= 2 independent grid steps when possible (review #3).
    if B * _cdiv(T, tt) * (c_pad // tile_c) < 2:
        if tt >= 32:
            tt = max(16, ((tt // 2) // 16) * 16)
        elif tile_c > _LANE:
            tile_c = _largest_channel_tile(c_pad, tile_c // 2)

    # Generation-aware VMEM fit (reviews #2, #9).
    budget = _vmem_budget_bytes()
    while _vmem_estimate_bytes(tt, tile_c) > budget and tile_c > _LANE:
        tile_c = _largest_channel_tile(c_pad, tile_c // 2)
    while _vmem_estimate_bytes(tt, tile_c) > budget and tt > 32:
        tt = max(16, ((tt // 2) // 16) * 16)

    nt = _cdiv(T, tt)
    P = tt + 8
    t_pad = nt * tt + _TAIL       # 8-row replicate halo on each side (+ tail padding)

    # ---- layout plumbing: [B,C,T] -> [B, time(padded), channel(padded)] ------
    # The edge pad implements UpSample1d's replicate padding exactly; extra rows past T
    # only feed discarded outputs.  (Transpose + pad is one copy-like XLA fusion.)
    xt = jnp.transpose(x, (0, 2, 1)).astype(jnp.float32)
    xt_pad = jnp.pad(xt, ((0, 0), (_HALO, t_pad - _HALO - T), (0, c_pad - C)), mode="edge")

    u_body, u_tail, d_mat = _build_fir_matrices(f_up, f_dn, tt)
    u_body = jnp.asarray(u_body)
    u_tail = jnp.asarray(u_tail)
    d_mat = jnp.asarray(d_mat)

    steps = B * nt * (c_pad // tile_c)
    flops_step = 2 * (2 * P) * (tt + _TAIL) * tile_c + 2 * tt * (2 * P) * tile_c
    cost = pl.CostEstimate(
        flops=steps * flops_step,
        transcendentals=steps * 2 * P * tile_c,
        bytes_accessed=steps * ((tt + _TAIL) + tt) * tile_c * 4,
    )
    est = _vmem_estimate_bytes(tt, tile_c)
    vmem_limit = int(min(budget, max(16 << 20, est + est // 4 + (4 << 20))))

    out_t = pl.pallas_call(
        _act1d_kernel,
        out_shape=jax.ShapeDtypeStruct((B, nt * tt, c_pad), out_dtype),
        grid=(B, nt, c_pad // tile_c),
        in_specs=[
            # banded FIR matrices: constant block index -> fetched once, not re-DMA'd
            pl.BlockSpec((2 * P, tt), lambda b, t, c: (0, 0)),
            pl.BlockSpec((2 * P, _TAIL), lambda b, t, c: (0, 0)),
            pl.BlockSpec((tt, 2 * P), lambda b, t, c: (0, 0)),
            # haloed input: body rows [t*tt, t*tt+tt) and tail rows [(t+1)*tt, (t+1)*tt+16)
            pl.BlockSpec((1, tt, tile_c), lambda b, t, c: (b, t, c)),
            pl.BlockSpec((1, _TAIL, tile_c), lambda b, t, c: (b, (t + 1) * (tt // _TAIL), c)),
        ],
        out_specs=pl.BlockSpec((1, tt, tile_c), lambda b, t, c: (b, t, c)),
        compiler_params=pltpu.CompilerParams(
            dimension_semantics=("parallel", "parallel", "parallel"),
            vmem_limit_bytes=vmem_limit),
        cost_estimate=cost,
    )(u_body, u_tail, d_mat, xt_pad, xt_pad)

    out = jnp.transpose(out_t[:, :T, :C], (0, 2, 1))   # back to [B, C, T]

    # ---- exact boundary patch (DownSample1d replicate pad affects only 3 samples/side) --
    ne = min(3, T)
    lc = min(9, T)
    left = _edge_reference(x[..., :lc], f_up, f_dn)[..., :ne]
    right = _edge_reference(x[..., T - lc:], f_up, f_dn)[..., -ne:]
    out = out.at[..., :ne].set(left.astype(out_dtype))
    out = out.at[..., T - ne:].set(right.astype(out_dtype))
    return out


# -----------------------------------------------------------------------------
# Direct (numpy, float64) reference of the PyTorch forward, for verification
# -----------------------------------------------------------------------------
def reference_numpy(x, f_up, f_dn, up_ratio=2, down_ratio=2, K=12):
    B, C, T = x.shape
    # UpSample1d
    pad = K // up_ratio - 1
    stride = up_ratio
    pad_left = pad * stride + (K - stride) // 2
    pad_right = pad * stride + (K - stride + 1) // 2
    xp = np.pad(x, ((0, 0), (0, 0), (pad, pad)), mode="edge")
    Tp = xp.shape[-1]
    Lfull = (Tp - 1) * stride + K
    y = np.zeros((B, C, Lfull), np.float64)
    for j in range(Tp):
        for k in range(K):
            y[..., j * stride + k] += xp[..., j] * f_up[k]
    y = up_ratio * y
    y = y[..., pad_left: Lfull - pad_right]
    # activation
    a = np.tanh(y)
    # DownSample1d
    pl_dn = K // 2 - 1
    pr_dn = K // 2
    ap = np.pad(a, ((0, 0), (0, 0), (pl_dn, pr_dn)), mode="edge")
    Tout = (ap.shape[-1] - K) // down_ratio + 1
    out = np.zeros((B, C, Tout), np.float64)
    for t in range(Tout):
        for k in range(K):
            out[..., t] += ap[..., t * down_ratio + k] * f_dn[k]
    return out


if __name__ == "__main__":
    f_up64 = kaiser_sinc_filter1d(0.25, 0.3, 12).astype(np.float64)
    f_dn64 = kaiser_sinc_filter1d(0.25, 0.3, 12).astype(np.float64)

    # (1) canonical small shape (channel padding 4 -> 128 lanes, single time tile)
    x1 = jax.random.normal(jax.random.PRNGKey(0), (2, 4, 16), dtype=jnp.float32)
    out1 = jax.block_until_ready(activation1d_forward(x1))
    assert out1.shape == (2, 4, 16)
    ref1 = reference_numpy(np.asarray(x1, np.float64), f_up64, f_dn64)
    np.testing.assert_allclose(np.asarray(out1), ref1, rtol=1e-3, atol=1e-4)

    # (2) multiple time tiles + multiple channel tiles + T not a multiple of the tile
    #     (exercises the halo BlockSpec, tile seams, padded tail and both edge patches)
    x2 = jax.random.normal(jax.random.PRNGKey(0), (1, 256, 97), dtype=jnp.float32)
    out2 = jax.block_until_ready(
        activation1d_forward(x2, time_tile=32, channel_tile=128))
    assert out2.shape == (1, 256, 97)
    ref2 = reference_numpy(np.asarray(x2, np.float64), f_up64, f_dn64)
    np.testing.assert_allclose(np.asarray(out2), ref2, rtol=1e-3, atol=1e-4)

    print("KERNEL_OK")
</pallas_src>

<mosaic_0001>
module attributes {stable_mosaic.version = 11 : i64} {
  func.func @_act1d_kernel(%arg0: i32, %arg1: i32, %arg2: i32, %arg3: memref<48x16xf32, #tpu.memory_space<vmem>>, %arg4: memref<48x16xf32, #tpu.memory_space<vmem>>, %arg5: memref<16x48xf32, #tpu.memory_space<vmem>>, %arg6: memref<1x16x128xf32, #tpu.memory_space<vmem>>, %arg7: memref<1x16x128xf32, #tpu.memory_space<vmem>>, %arg8: memref<1x16x128xf32, #tpu.memory_space<vmem>>) attributes {dimension_semantics = [#tpu.dimension_semantics<parallel>, #tpu.dimension_semantics<parallel>, #tpu.dimension_semantics<parallel>], iteration_bounds = array<i64: 2, 1, 1>, scalar_prefetch = 0 : i64, scratch_operands = 0 : i64, tpu.core_type = #tpu.core_type<tc>, window_params = [{pipeline_mode = #tpu.pipeline_mode<synchronous>, transform_indices = @transform_0, window_bounds = array<i64: 48, 16>}, {pipeline_mode = #tpu.pipeline_mode<synchronous>, transform_indices = @transform_1, window_bounds = array<i64: 48, 16>}, {pipeline_mode = #tpu.pipeline_mode<synchronous>, transform_indices = @transform_2, window_bounds = array<i64: 16, 48>}, {transform_indices = @transform_3, window_bounds = array<i64: 1, 16, 128>}, {transform_indices = @transform_4, window_bounds = array<i64: 1, 16, 128>}, {transform_indices = @transform_5, window_bounds = array<i64: 1, 16, 128>}]} {
    %c0 = arith.constant 0 : index
    %c0_0 = arith.constant 0 : index
    %c0_1 = arith.constant 0 : index
    %0 = vector.load %arg6[%c0, %c0_0, %c0_1] : memref<1x16x128xf32, #tpu.memory_space<vmem>>, vector<1x16x128xf32>
    %1 = vector.shape_cast %0 : vector<1x16x128xf32> to vector<16x128xf32>
    %c0_2 = arith.constant 0 : index
    %c0_3 = arith.constant 0 : index
    %c0_4 = arith.constant 0 : index
    %2 = vector.load %arg7[%c0_2, %c0_3, %c0_4] : memref<1x16x128xf32, #tpu.memory_space<vmem>>, vector<1x16x128xf32>
    %3 = vector.shape_cast %2 : vector<1x16x128xf32> to vector<16x128xf32>
    %c0_5 = arith.constant 0 : index
    %c0_6 = arith.constant 0 : index
    %4 = vector.load %arg3[%c0_5, %c0_6] : memref<48x16xf32, #tpu.memory_space<vmem>>, vector<48x16xf32>
    %cst = arith.constant dense<0.000000e+00> : vector<48x128xf32>
    %5 = tpu.matmul %4, %1, %cst {dimension_numbers = #tpu.dot_dimension_numbers<[1], [0], [0], [1], [0, 0, 1, 1], [], []>} : vector<48x16xf32>, vector<16x128xf32>, vector<48x128xf32> -> vector<48x128xf32>
    %c0_7 = arith.constant 0 : index
    %c0_8 = arith.constant 0 : index
    %6 = vector.load %arg4[%c0_7, %c0_8] : memref<48x16xf32, #tpu.memory_space<vmem>>, vector<48x16xf32>
    %cst_9 = arith.constant dense<0.000000e+00> : vector<48x128xf32>
    %7 = tpu.matmul %6, %3, %cst_9 {dimension_numbers = #tpu.dot_dimension_numbers<[1], [0], [0], [1], [0, 0, 1, 1], [], []>} : vector<48x16xf32>, vector<16x128xf32>, vector<48x128xf32> -> vector<48x128xf32>
    %8 = arith.addf %5, %7 : vector<48x128xf32>
    %9 = math.tanh %8 : vector<48x128xf32>
    %c0_10 = arith.constant 0 : index
    %c0_11 = arith.constant 0 : index
    %10 = vector.load %arg5[%c0_10, %c0_11] : memref<16x48xf32, #tpu.memory_space<vmem>>, vector<16x48xf32>
    %cst_12 = arith.constant dense<0.000000e+00> : vector<16x128xf32>
    %11 = tpu.matmul %10, %9, %cst_12 {dimension_numbers = #tpu.dot_dimension_numbers<[1], [0], [0], [1], [0, 0, 1, 1], [], []>} : vector<16x48xf32>, vector<48x128xf32>, vector<16x128xf32> -> vector<16x128xf32>
    %c0_13 = arith.constant 0 : index
    %c0_14 = arith.constant 0 : index
    %c0_15 = arith.constant 0 : index
    %12 = vector.load %arg8[%c0_13, %c0_14, %c0_15] : memref<1x16x128xf32, #tpu.memory_space<vmem>>, vector<1x16x128xf32>
    %13 = vector.shape_cast %12 : vector<1x16x128xf32> to vector<16x128xf32>
    %14 = vector.shape_cast %11 : vector<16x128xf32> to vector<1x16x128xf32>
    tpu.vector_store %arg8[%c0_13, %c0_14, %c0_15], %14 {strides = array<i32>} : memref<1x16x128xf32, #tpu.memory_space<vmem>>, vector<1x16x128xf32>,
    return
  }
  func.func @transform_0(%arg0: i32, %arg1: i32, %arg2: i32) -> (i32, i32) {
    %c0_i32 = arith.constant 0 : i32
    %c0_i32_0 = arith.constant 0 : i32
    %c0_i32_1 = arith.constant 0 : i32
    return %c0_i32, %c0_i32_0 : i32, i32
  }
  func.func @transform_1(%arg0: i32, %arg1: i32, %arg2: i32) -> (i32, i32) {
    %c0_i32 = arith.constant 0 : i32
    %c0_i32_0 = arith.constant 0 : i32
    %c0_i32_1 = arith.constant 0 : i32
    return %c0_i32, %c0_i32_0 : i32, i32
  }
  func.func @transform_2(%arg0: i32, %arg1: i32, %arg2: i32) -> (i32, i32) {
    %c0_i32 = arith.constant 0 : i32
    %c0_i32_0 = arith.constant 0 : i32
    %c0_i32_1 = arith.constant 0 : i32
    return %c0_i32, %c0_i32_0 : i32, i32
  }
  func.func @transform_3(%arg0: i32, %arg1: i32, %arg2: i32) -> (i32, i32, i32) {
    %c0_i32 = arith.constant 0 : i32
    return %arg0, %arg1, %arg2 : i32, i32, i32
  }
  func.func @transform_4(%arg0: i32, %arg1: i32, %arg2: i32) -> (i32, i32, i32) {
    %c1_i32 = arith.constant 1 : i32
    %0 = arith.addi %arg1, %c1_i32 : i32
    %c1_i32_0 = arith.constant 1 : i32
    %1 = arith.muli %0, %c1_i32_0 : i32
    %c0_i32 = arith.constant 0 : i32
    return %arg0, %1, %arg2 : i32, i32, i32
  }
  func.func @transform_5(%arg0: i32, %arg1: i32, %arg2: i32) -> (i32, i32, i32) {
    %c0_i32 = arith.constant 0 : i32
    return %arg0, %arg1, %arg2 : i32, i32, i32
  }
}

</mosaic_0001>

<bundles_post_ra>
// kernel: tpu_custom_call.1
= control target key start
LH: loop header
LB: loop body
LE: loop exit
PB: predicated region body
PF: predicated region fallthrough
CT: control target
= control target key end

     0   :  { %10 = vsyncpa [#allocation3], 0  ;;  %s1377_s0 = inlined_call_operand.vmem [shape: f32[48,16], index: 0, kind: input, shape index: {}]   ;;  %s1378_s1 = inlined_call_operand.vmem [shape: f32[48,16], index: 1, kind: input, shape index: {}]   ;;  %s1379_s2 = inlined_call_operand.hbm [shape: f32[16,48], index: 2, kind: input, shape index: {}]   ;;  %s1380_s3 = inlined_call_operand.vmem [shape: f32[2,32,128], index: 3, kind: input, shape index: {}]   ;;  %s1381_s4 = inlined_call_operand.vmem [shape: f32[2,32,128], index: 4, kind: input, shape index: {}]   ;;  %s1382_s5 = inlined_call_operand.hbm [shape: f32[2,16,128], index: 5, kind: output, shape index: {}]  }
   0x1   :  { %11 = vsyncpa [#allocation4], 0 }
   0x2   :  { %13 = vsyncpa [#allocation4 + $0x1], 0  ;;  %s1171_s18 = smov 0   ;;  %s1173_s19 = smov 0  }
   0x3   :  { %s1175_s20 = smov 0   ;;  %s1177_s21 = smov 0  }
   0x4   :  { %s1179_s22 = smov 0   ;;  %s1181_s23 = smov 0  }
   0x5 LB: > { %s814_s24 = sadd.s32 4294967295, %s1133_s23   ;;  %s815_s25 = sadd.s32 4294967294, %s1133_s23   ;;  %s1133_s23 = sphi %s1181_s23, %s19_s23   ;;  %s1129_s22 = sphi %s1179_s22, %s1400_s22   ;;  %s1125_s21 = sphi %s1177_s21, %s1399_s21   ;;  %s1121_s20 = sphi %s1175_s20, %s1398_s20   ;;  %s1117_s19 = sphi %s1173_s19, %s1397_s19   ;;  %s1113_s18 = sphi %s1171_s18, %s1396_s18  }
   0x6   : > { %s38_s26 = sadd.s32 1, %s1129_s22  ;;  %s174_s27 = sadd.s32 1, %s1121_s20 }
   0x7   : > { %p40_p0 = scmp.ge.s32.totalorder %s38_s26, 2  ;;  %p184_p1 = scmp.ne.s32.totalorder %s1121_s20, %s1117_s19 }
   0x8   : > { %p185_p2 = scmp.eq.s32.totalorder %s814_s24, 1  ;;  %p190_p3 = scmp.ne.s32.totalorder %s1117_s19, %s1113_s18 }
   0x9   : > { %s1402_s26 = smov (%p40_p0, %s38_s26), 0  ;;  %p191_p5 = scmp.eq.s32.totalorder %s815_s25, 1 }
   0xa   : > { %p1211_p4 = por %p185_p2, %p184_p1  ;;  %s167_s29 = ssub.s32 %s1129_s22, %s1402_s26 }
   0xb   : > { %p816_p6 = scmp.ge.s32.totalorder %s1133_s23, 1  ;;  %p172_p7 = scmp.eq.s32.totalorder %s167_s29, 0 }
   0xc   : > { %s1387_s28 = scalar_select %p1211_p4, 1, 0 }
   0xd   : > { %p1218_p8 = por %p191_p5, %p190_p3  ;;  %p198_p9 = scmp.lt.s32.totalorder %s1133_s23, 3 }
   0xe   : > { %s1224_s6 = scalar_select %p172_p7, %s1121_s20, %s174_s27  }
   0xf   : > { %s1388_s30 = scalar_select %p1218_p8, 1, 0 }
  0x10   : > { %p1226_p10 = pnand %p816_p6, %p198_p9  ;;  %p1230_p11 = scmp.eq.s32.totalorder %s814_s24, 0 }
  0x11   : > { %s1135_s9 = smov [#allocation2]   ;;  %s1023_s14 = scalar_lea.hbm %s1379_s2, 256 }
  0x12   : > { %s1389_s7 = scalar_select %p1226_p10, 1, 0 }
  0x13   : > { %s1390_s8 = scalar_select %p1230_p11, 1, 0 }
  0x14   : > { %p947_p12 = pneg %p1226_p10  ;;  %s216_s10 = sshll.u32 %s1135_s9, 4  ;;  %s217_s10 = int_to_ptr.vmem [resolvable:$true] %s216_s10 }
  0x15   : > { %p1024_p0 = scmp.ne.s32.totalorder %s1379_s2, %s1023_s14  ;;  %p1030_p5 = scmp.lt.u32.totalorder %s1023_s14, %s1379_s2 }
  0x16   : > { %p1238_p13 = pnand %p1230_p11, %p947_p12 }
  0x18   : > { %p1025_p1 = pneg %p1238_p13 }
  0x1a   : > { %p1026_p2 = pnand %p1025_p1, %p1024_p0 }
  0x1c   : > { %p1027_p3 = pneg %p1026_p2 }
  0x1e   : > { %p1032_p6 = pnand %p1030_p5, %p1027_p3 }
  0x20   : > { %1035 = shalt.err (!%p1032_p6)
}
  0x21   : > { %s1036_s25 = scalar_lea.vmem %s217_s10, 256  ;;  %p1044_p8 = scmp.lt.s32.totalorder %s217_s10, %s217_s10 }
  0x22   : > { %p1037_p7 = scmp.ne.s32.totalorder %s217_s10, %s1036_s25  ;;  %p1045_p4 = scmp.lt.s32.totalorder %s1036_s25, %s1036_s25 }
  0x24   : > { %p1039_p9 = pnand %p1037_p7, %p1025_p1  ;;  %p1046_p11 = por %p1045_p4, %p1044_p8 }
  0x26   : > { %p1040_p12 = pneg %p1039_p9 }
  0x28   : > { %p1047_p10 = pnand %p1046_p11, %p1040_p12 }
  0x2a   : > { %1050 = shalt.err (!%p1047_p10)
}
  0x2b   : > { %s1136_s27 = smov 128   ;;  %s1137_s29 = smov 8  }
  0x2c   : > { %950 = dma.hbm_to_vmem [thread:$0]  (!%p1238_p13), %s1379_s2, 256, %s217_s10, [#allocation3], %s1136_s27, %s1136_s27, %s1137_s29  }
  0x2d   : > { %p1392_p0 = scmp.ne.s32.totalorder %s1389_s7, 0 }
  0x2e   : > { %p1393_p2 = scmp.ne.s32.totalorder (!%p1392_p0), %s1390_s8, 0 }
  0x2f   : > { %266 = sbr.rel (%p1392_p0) target bundleno = 537 (0x219), region = 40 }
  0x36   : > { %1104 = dma.done.wait (%p1393_p2), [#allocation3], 256  }
  0x37   : > { %1106 = vsyncadd (%p1393_p2), [#allocation3], 4294967040  ;;  %p315_p4 = scmp.lt.s32.totalorder %s1125_s21, 1  ;;  %vm359_vm0 = vcmask 130048   ;;  %v353_v5 = vld [vmem:[%s1378_s1] sm:$0xff]  ;;  %v354_v8 = vld [vmem:[%s1378_s1 + $0x8] sm:$0xff] }
  0x38   : > { %v347_v6 = vld [vmem:[%s1377_s0] sm:$0xff]  ;;  %878 = vmatprep.mubr.msk.f32.mxu1 %vm359_vm0, %v353_v5  ;;  %v348_v9 = vld [vmem:[%s1377_s0 + $0x8] sm:$0xff]  ;;  %v355_v10 = vld [vmem:[%s1378_s1 + $0x10] sm:$0xff]  ;;  %vm594_vm1 = vcmask 392192   ;;  %s311_s11 = sand.u32 1, %s1117_s19   ;;  %s848_s24 = sshll.u32 %s1125_s21, 8 }
  0x39   : > { %s316_s13 = scalar_select %p315_p4, %s1125_s21, 1  ;;  %891 = vmatprep.mubr.msk.f32.mxu0 %vm359_vm0, %v347_v6  ;;  %v349_v11 = vld [vmem:[%s1377_s0 + $0x10] sm:$0xff]  ;;  %v356_v12 = vld [vmem:[%s1378_s1 + $0x18] sm:$0xff]  ;;  %v357_v14 = vld [vmem:[%s1378_s1 + $0x20] sm:$0xff] }
  0x3a   : > { %v350_v13 = vld [vmem:[%s1377_s0 + $0x18] sm:$0xff]  ;;  %v351_v15 = vld [vmem:[%s1377_s0 + $0x20] sm:$0xff]  ;;  %v358_v16 = vld [vmem:[%s1378_s1 + $0x28] sm:$0xff]  ;;  %s821_s16 = sshll.u32 %s311_s11, 4  ;;  %s1329_s25 = scalar_lea.hbm %s1382_s5, %s848_s24 }
  0x3b   : > { %s845_s14 = sshll.u32 %s316_s13, 5  ;;  %v352_v17 = vld [vmem:[%s1377_s0 + $0x28] sm:$0xff]  ;;  %v592_v18 = vld [vmem:[#allocation2] sm:$0xff]  ;;  %v593_v46 = vld [vmem:[#allocation2 + $0x8] sm:$0xff]  ;;  %s1331_s27 = scalar_lea.sflag [#allocation4], %s311_s11 }
  0x3c   : > { %s847_s15 = sadd.s32 16, %s845_s14  ;;  %s325_s17 = scalar_lea.vmem %s1380_s3, %s845_s14 }
  0x3d   : > { %s339_s7 = scalar_lea.vmem %s1381_s4, %s847_s15  ;;  %v343_v2 = vld [vmem:[%s325_s17] sm:$0xff]  ;;  %v344_v4 = vld [vmem:[%s325_s17 + $0x8] sm:$0xff]  ;;  %s313_s17 = scalar_lea.vmem [#allocation5], %s821_s16 }
  0x3e   : > { %v345_v0 = vld [vmem:[%s339_s7] sm:$0xff]  ;;  %v346_v1 = vld [vmem:[%s339_s7 + $0x8] sm:$0xff]  ;;  %v919_v7 = vpack.c.bf16 %v344_v4, %v343_v2  ;;  %s695_s10 = sshll.u32 %s313_s17, 4  ;;  %p1394_p10 = scmp.ne.s32.totalorder %s1387_s28, 0  ;;  %s1324_s10 = int_to_ptr.vmem [resolvable:$true] %s695_s10 }
  0x3f   : > { %v915_v3 = vpack.c.bf16 %v346_v1, %v345_v0  ;;  %s1051_s29 = scalar_lea.vmem %s1324_s10, 256  ;;  %s1138_s21 = smov [#allocation5]  }
  0x40   : > { %920 = vmatprep.subr.bf16.mxu0 %v919_v7  ;;  %p1052_p8 = scmp.ne.s32.totalorder %s1324_s10, %s1051_s29  ;;  %s1055_s9 = sshll.u32 %s1138_s21, 4  ;;  %s1056_s9 = int_to_ptr.vmem [resolvable:$false] %s1055_s9 }
  0x41   : > { %916 = vmatprep.subr.bf16.mxu1 %v915_v3  ;;  %922 = vmatpush3.bf16.msra.mxu0 %v919_v7  ;;  %s1057_s12 = scalar_lea.vmem %s1056_s9, 512  ;;  %p1058_p1 = scmp.lt.s32.totalorder %s1324_s10, %s1056_s9 }
  0x42   : > { %918 = vmatpush3.bf16.msra.mxu1 %v915_v3  ;;  %p1053_p11 = pnand %p1052_p8, %p1394_p10  ;;  %p1059_p3 = scmp.lt.s32.totalorder %s1057_s12, %s1051_s29 }
  0x44   : > { %892 = vmatmul.mubr.msk.f32.vlgmr.msra.gmra.mrb[0].mxu0 %vm359_vm0, %v348_v9  ;;  %p1054_p13 = pneg %p1053_p11  ;;  %p1060_p5 = por %p1059_p3, %p1058_p1 }
  0x45   : > { %879 = vmatmul.mubr.msk.f32.vlgmr.msra.gmra.mrb[0].mxu1 %vm359_vm0, %v354_v8  ;;  %894 = vmatprep.mubr.msk.f32.mxu0 %vm359_vm0, %v349_v11 }
  0x46   : > { %881 = vmatprep.mubr.msk.f32.mxu1 %vm359_vm0, %v355_v10  ;;  %p1061_p6 = pnand %p1060_p5, %p1054_p13 }
  0x48   : > { %895 = vmatmul.mubr.msk.f32.gmra.mrb[2].mxu0 %vm359_vm0, %v350_v13 }
  0x49   : > { %882 = vmatmul.mubr.msk.f32.gmra.mrb[2].mxu1 %vm359_vm0, %v356_v12  ;;  %897 = vmatprep.mubr.msk.f32.mxu0 %vm359_vm0, %v351_v15 }
  0x4a   : > { %884 = vmatprep.mubr.msk.f32.mxu1 %vm359_vm0, %v357_v14 }
  0x4c   : > { %898 = vmatmul.mubr.msk.f32.gmra.mrb[4].mxu0 %vm359_vm0, %v352_v17 }
  0x4d   : > { %885 = vmatmul.mubr.msk.f32.gmra.mrb[4].mxu1 %vm359_vm0, %v358_v16 }
  0x4e   : > { %912 = vmatprep.mubr.msk.f32.mxu1 %vm594_vm1, %v592_v18 }
 0x117   : > { %v893_v20 = vpop.f32.mrb[0].mxu0 }
 0x118   : > { %v880_v19 = vpop.f32.mrb[0].mxu1  ;;  %v557_v23 = vpop.f32.mrb[1].mxu0 }
 0x119   : > { %v444_v21 = vpop.f32.mrb[1].mxu1  ;;  %v563_v22 = vadd.f32 %v893_v20, %v880_v19 }
 0x11a   : > { %v558_v24 = vadd.f32 %v557_v23, %v444_v21 }
 0x11b   : > { %1011 = vtanh.f32 %v563_v22  ;;  %v896_v26 = vpop.f32.mrb[2].mxu0 }
 0x11c   : > { %v883_v25 = vpop.f32.mrb[2].mxu1  ;;  %1013 = vtanh.f32 %v558_v24  ;;  %v567_v29 = vpop.f32.mrb[3].mxu0 }
 0x11d   : > { %v454_v27 = vpop.f32.mrb[3].mxu1  ;;  %v573_v28 = vadd.f32 %v896_v26, %v883_v25 }
 0x11e   : > { %v568_v30 = vadd.f32 %v567_v29, %v454_v27 }
 0x11f   : > { %1015 = vtanh.f32 %v573_v28  ;;  %v899_v32 = vpop.f32.mrb[4].mxu0 }
 0x120   : > { %v886_v31 = vpop.f32.mrb[4].mxu1  ;;  %1017 = vtanh.f32 %v568_v30  ;;  %v577_v35 = vpop.f32.mrb[5].mxu0 }
 0x121   : > { %v464_v33 = vpop.f32.mrb[5].mxu1  ;;  %v583_v34 = vadd.f32 %v899_v32, %v886_v31 }
 0x122   : > { %v578_v36 = vadd.f32 %v577_v35, %v464_v33 }
 0x123   : > { %1019 = vtanh.f32 %v583_v34 }
 0x124   : > { %1021 = vtanh.f32 %v578_v36 }
 0x125   : > { %v1012_v37 = vpop.eup %1011 }
 0x126   : > { %v1014_v38 = vpop.eup %1013 }
 0x127   : > { %v923_v39 = vpack.c.bf16 %v1012_v37, %v1014_v38 }
 0x129   : > { %v1016_v40 = vpop.eup %1015  ;;  %924 = vmatprep.subr.bf16.mxu1 %v923_v39 }
 0x12a   : > { %v1018_v41 = vpop.eup %1017  ;;  %926 = vmatpush3.bf16.msra.mxu1 %v923_v39 }
 0x12b   : > { %v927_v42 = vpack.c.bf16 %v1016_v40, %v1018_v41 }
 0x12d   : > { %v1020_v43 = vpop.eup %1019  ;;  %928 = vmatprep.subr.bf16.mxu1 %v927_v42 }
 0x12e   : > { %v1022_v44 = vpop.eup %1021  ;;  %930 = vmatpush3.bf16.msra.mxu1 %v927_v42 }
 0x12f   : > { %v931_v45 = vpack.c.bf16 %v1020_v43, %v1022_v44 }
 0x131   : > { %932 = vmatprep.subr.bf16.mxu1 %v931_v45 }
 0x132   : > { %934 = vmatpush3.bf16.msra.mxu1 %v931_v45 }
 0x135   : > { %913 = vmatmul.mubr.msk.f32.vlgmr.msra.gmra.mrb[6].mxu1 %vm594_vm1, %v593_v46 }
 0x208   : > { %v914_v47 = vpop.f32.mrb[6].mxu1 }
 0x209   : > { %677 = vst [vmem:[%s313_s17 + $0x8] sm:$0xff] %v914_v47  ;;  %v667_v48 = vpop.f32.mrb[7].mxu1 }
 0x20a   : > { %676 = vst [vmem:[%s313_s17] sm:$0xff] %v667_v48 }
 0x20b   : > { %1064 = shalt.err (!%p1061_p6)
}
 0x20c   : > { %s1065_s13 = scalar_lea.hbm %s1329_s25, 256  ;;  %s1069_s11 = scalar_lea.hbm %s1382_s5, 512 }
 0x20d   : > { %p1066_p7 = scmp.ne.s32.totalorder %s1329_s25, %s1065_s13  ;;  %p1070_p0 = scmp.lt.u32.totalorder %s1329_s25, %s1382_s5 }
 0x20e   : > { %p1071_p2 = scmp.lt.u32.totalorder %s1069_s11, %s1065_s13  ;;  %p1073_p8 = scmp.lt.u32.totalorder %s1065_s13, %s1329_s25 }
 0x20f   : > { %p1067_p9 = pnand %p1066_p7, %p1394_p10 }
 0x210   : > { %p1072_p4 = por %p1071_p2, %p1070_p0 }
 0x211   : > { %p1068_p12 = pneg %p1067_p9 }
 0x212   : > { %p1074_p11 = por %p1073_p8, %p1072_p4 }
 0x214   : > { %p1075_p13 = pnand %p1074_p11, %p1068_p12 }
 0x216   : > { %1078 = shalt.err (!%p1075_p13)
}
 0x217   : > { %s1139_s24 = smov 128   ;;  %s1140_s7 = smov 8  }
 0x218   : > { %945 = dma.vmem_to_hbm [thread:$0]  (%p1394_p10), %s1324_s10, 256, %s1329_s25, %s1331_s27, %s1139_s24, %s1139_s24, %s1140_s7  }
 0x219 PF: > { %p957_p1 = scmp.ge.s32.totalorder %s1133_s23, 2  ;;  %s710_s8 = sand.u32 1, %s1113_s18  }
 0x21a   : > { %p1395_p3 = scmp.ne.s32.totalorder %s1388_s30, 0  ;;  %s711_s29 = scalar_lea.sflag [#allocation4], %s710_s8 }
 0x21c   : > { %p952_p5 = pnand %p957_p1, %p1395_p3 }
 0x21e   : > { %1108 = dma.done.wait (!%p952_p5), %s711_s29, 256  }
 0x21f   : > { %1110 = vsyncadd (!%p952_p5), %s711_s29, 4294967040  ;;  %s19_s23 = sadd.s32 1, %s1133_s23   ;;  %s1396_s18 = smov %s1117_s19 }
 0x220   : > { %p16_p6 = scmp.ge.s32.totalorder %s19_s23, 4   ;;  %s1397_s19 = smov %s1121_s20 }
 0x221   : > { %s1398_s20 = smov %s1224_s6  ;;  %s1399_s21 = smov %s1129_s22 }
 0x222   : > { %s1400_s22 = smov %s1402_s26  ;;  %18 = sbr.rel (!%p16_p6) target bundleno = 5 (0x5), region = 83 }
 0x229   :  { %716 = vsyncpa [#allocation3], 1 }
 0x22a   :  { %718 = vsyncpa [#allocation3 + $0x1], 1 }
 0x22b   :  { %719 = vsyncpa [#allocation4], 1 }
 0x22c   :  { %721 = vsyncpa [#allocation4 + $0x1], 1 }

</bundles_post_ra>
